<compile_context>
chip_gen: v6e
topology: v6e:2x2x1
jax: 0.10.0
libtpu: 0.0.40
codegen_flags: <defaults>
</compile_context>

<pallas_src>
import functools

import jax
import jax.numpy as jnp
from jax.experimental import pallas as pl
from jax.experimental.pallas import tpu as pltpu

NUM_CLASSES = 20          # config['global']['num_classes'] (synthetic choice)
IN_FEATURES = 4096
SVD_T = 256               # requested rank; effective rank is min(out_dim, 256)
LANES = 128


# ----------------------------------------------------------------------------
# Parameter construction (init-time glue, plain JAX)
# ----------------------------------------------------------------------------
def truncated_svd_decomposition(W, t):
    """JAX equivalent of the PyTorch helper.

    Returns (A, B) with A = V_t * S_t  (shape [in, k]) and B = U_t
    (shape [out, k]), so that  y = (x @ A) @ B.T + bias .
    """
    U, S, Vh = jnp.linalg.svd(W, full_matrices=False)
    k = min(t, S.shape[0])              # reduced SVD => rank min(out, in)
    A = Vh.T[:, :k] * S[:k][None, :]    # first (bias-free) linear
    B = U[:, :k]                        # second linear weight (later re-initialized)
    return A, B


def init_params(key, num_classes=NUM_CLASSES):
    c_cls = num_classes + 1
    c_bb = 4 * (num_classes + 1)
    k1, k2, k3, k4 = jax.random.split(key, 4)

    # original (pre-compression) nn.Linear weights, PyTorch-style uniform init
    bound = 1.0 / (IN_FEATURES ** 0.5)
    W_cls = jax.random.uniform(k1, (c_cls, IN_FEATURES), jnp.float32, -bound, bound)
    W_bb = jax.random.uniform(k2, (c_bb, IN_FEATURES), jnp.float32, -bound, bound)

    a_cls, _ = truncated_svd_decomposition(W_cls, SVD_T)
    a_bb, _ = truncated_svd_decomposition(W_bb, SVD_T)

    # nn.init.normal_(second_layer.weight, std=...), nn.init.constant_(bias, 0)
    B_cls = 0.01 * jax.random.normal(k3, (c_cls, a_cls.shape[1]), jnp.float32)
    B_bb = 0.001 * jax.random.normal(k4, (c_bb, a_bb.shape[1]), jnp.float32)
    bias_cls = jnp.zeros((c_cls,), jnp.float32)
    bias_bb = jnp.zeros((c_bb,), jnp.float32)

    # store second-layer weights transposed so downstream code multiplies directly
    return (a_cls, B_cls.T, bias_cls, a_bb, B_bb.T, bias_bb)


# ----------------------------------------------------------------------------
# Tiling helpers
# ----------------------------------------------------------------------------
def _round_up(x, m):
    return ((x + m - 1) // m) * m


def _pick_tm(n, preferred=256):
    """Batch tile: big enough to fill MXU rows, multiple of 16 (bf16 sublane
    packing), and kept small enough that >=2 grid steps exist when the batch
    allows it (so both v7x TensorCores get work via the parallel grid axis)."""
    n_r = _round_up(max(n, 1), 16)
    tm = min(preferred, n_r)
    if n_r > 16 and pl.cdiv(n_r, tm) < 2:
        tm = _round_up(max(n_r // 2, 16), 16)
    return tm


# ----------------------------------------------------------------------------
# Param packing: fold the rank-deficient two-stage products into one effective
# weight per head and fuse both heads column-wise into a 128-lane slab.
# This is the same linear map as the reference (A @ B^T), just pre-multiplied.
# Done ONCE, outside the per-call path.
# ----------------------------------------------------------------------------
def pack_params(params, num_classes=NUM_CLASSES):
    a_cls, bT_cls, bias_cls, a_bb, bT_bb, bias_bb = params
    c_cls = num_classes + 1
    c_bb = 4 * (num_classes + 1)
    c_tot = c_cls + c_bb                       # 105
    c_pad = _round_up(c_tot, LANES)            # 128 -> unmasked lane-dense stores

    w_eff = jnp.concatenate([a_cls @ bT_cls, a_bb @ bT_bb], axis=1)   # (F, 105) f32
    w_eff = jnp.pad(w_eff, ((0, 0), (0, c_pad - c_tot))).astype(jnp.bfloat16)
    bias = jnp.concatenate([bias_cls, bias_bb])
    bias = jnp.pad(bias, (0, c_pad - c_tot)).astype(jnp.float32)[None, :]
    return w_eff, bias                          # (4096, 128) bf16, (1, 128) f32


# ----------------------------------------------------------------------------
# Pallas kernel: one fused, folded, lane-dense matmul for both heads
# ----------------------------------------------------------------------------
def _fused_head_kernel(x_ref, w_ref, b_ref, o_ref):
    # bf16 operands on the MXU, f32 accumulation; bias add stays in f32
    # (v5e has no bf16 VPU path).
    acc = jnp.dot(x_ref[...], w_ref[...], preferred_element_type=jnp.float32)
    o_ref[...] = acc + b_ref[...]


@functools.partial(jax.jit, static_argnames=("num_classes", "tm"))
def object_detection_head(feat, w_eff, bias, *, num_classes=NUM_CLASSES, tm=None):
    """feat: (N, 4096) float32; (w_eff, bias) from pack_params.
    Returns (cls_score (N, C+1), bbox (N, C+1, 4))."""
    N, F = feat.shape
    assert F == IN_FEATURES
    c_cls = num_classes + 1
    c_tot = c_cls + 4 * (num_classes + 1)      # 105
    c_pad = w_eff.shape[1]                     # 128

    if tm is None:
        tm = _pick_tm(N)
    n_pad = _round_up(N, tm)

    x = feat.astype(jnp.bfloat16)              # halve HBM feat traffic
    if n_pad != N:
        x = jnp.pad(x, ((0, n_pad - N), (0, 0)))

    out = pl.pallas_call(
        _fused_head_kernel,
        out_shape=jax.ShapeDtypeStruct((n_pad, c_pad), jnp.float32),
        grid_spec=pltpu.PrefetchScalarGridSpec(
            num_scalar_prefetch=0,
            grid=(n_pad // tm,),
            in_specs=[
                pl.BlockSpec((tm, F), lambda i: (i, 0)),      # feat tile
                pl.BlockSpec((F, c_pad), lambda i: (0, 0)),   # fused folded weights (grid-invariant)
                pl.BlockSpec((1, c_pad), lambda i: (0, 0)),   # fused bias (f32)
            ],
            out_specs=pl.BlockSpec((tm, c_pad), lambda i: (i, 0)),
        ),
        compiler_params=pltpu.CompilerParams(
            dimension_semantics=("parallel",)),
    )(x, w_eff, bias)

    out = out[:N]
    cls_score = out[:, :c_cls]
    bbox = out[:, c_cls:c_tot].reshape(-1, num_classes + 1, 4)  # == .view(-1, C+1, 4)
    return cls_score, bbox


# ----------------------------------------------------------------------------
# Pure-JAX reference (unfolded, f32)
# ----------------------------------------------------------------------------
def reference(feat, params, num_classes=NUM_CLASSES):
    a_cls, bT_cls, bias_cls, a_bb, bT_bb, bias_bb = params
    cls = feat @ a_cls @ bT_cls + bias_cls
    bb = (feat @ a_bb @ bT_bb + bias_bb).reshape(-1, num_classes + 1, 4)
    return cls, bb


if __name__ == "__main__":
    key = jax.random.PRNGKey(0)
    pkey, xkey1, xkey2 = jax.random.split(key, 3)
    params = init_params(pkey)
    packed = pack_params(params)               # fold + fuse once, outside the call path

    def rel_err(a, b):
        return jnp.linalg.norm(a - b) / (jnp.linalg.norm(b) + 1e-12)

    # small batch of ROI features
    N1 = 16
    feat1 = jax.random.normal(xkey1, (N1, IN_FEATURES), jnp.float32)
    cls_k, bbox_k = object_detection_head(feat1, *packed)
    cls_k = jax.block_until_ready(cls_k)
    bbox_k = jax.block_until_ready(bbox_k)
    cls_r, bbox_r = reference(feat1, params)
    assert cls_k.shape == (N1, NUM_CLASSES + 1)
    assert bbox_k.shape == (N1, NUM_CLASSES + 1, 4)
    assert float(rel_err(cls_k, cls_r)) < 1e-2, "cls mismatch"
    assert float(rel_err(bbox_k, bbox_r)) < 1e-2, "bbox mismatch"

    # batch size that is NOT a multiple of the tile -> exercises the padding path
    N2 = 10
    feat2 = jax.random.normal(xkey2, (N2, IN_FEATURES), jnp.float32)
    cls_k2, bbox_k2 = object_detection_head(feat2, *packed)
    cls_k2 = jax.block_until_ready(cls_k2)
    bbox_k2 = jax.block_until_ready(bbox_k2)
    cls_r2, bbox_r2 = reference(feat2, params)
    assert cls_k2.shape == (N2, NUM_CLASSES + 1)
    assert bbox_k2.shape == (N2, NUM_CLASSES + 1, 4)
    assert float(rel_err(cls_k2, cls_r2)) < 1e-2, "cls mismatch (padded batch)"
    assert float(rel_err(bbox_k2, bbox_r2)) < 1e-2, "bbox mismatch (padded batch)"

    print("KERNEL_OK")
</pallas_src>

<mosaic_0001>
module attributes {stable_mosaic.version = 11 : i64} {
  func.func @_fused_head_kernel(%arg0: i32, %arg1: memref<16x4096xbf16, #tpu.memory_space<vmem>>, %arg2: memref<4096x128xbf16, #tpu.memory_space<vmem>>, %arg3: memref<1x128xf32, #tpu.memory_space<vmem>>, %arg4: memref<16x128xf32, #tpu.memory_space<vmem>>) attributes {dimension_semantics = [#tpu.dimension_semantics<parallel>], iteration_bounds = array<i64: 1>, scalar_prefetch = 0 : i64, scratch_operands = 0 : i64, tpu.core_type = #tpu.core_type<tc>, window_params = [{transform_indices = @transform_0, window_bounds = array<i64: 16, 4096>}, {pipeline_mode = #tpu.pipeline_mode<synchronous>, transform_indices = @transform_1, window_bounds = array<i64: 4096, 128>}, {pipeline_mode = #tpu.pipeline_mode<synchronous>, transform_indices = @transform_2, window_bounds = array<i64: 1, 128>}, {transform_indices = @transform_3, window_bounds = array<i64: 16, 128>}]} {
    %c0 = arith.constant 0 : index
    %c0_0 = arith.constant 0 : index
    %0 = vector.load %arg1[%c0, %c0_0] : memref<16x4096xbf16, #tpu.memory_space<vmem>>, vector<16x4096xbf16>
    %c0_1 = arith.constant 0 : index
    %c0_2 = arith.constant 0 : index
    %1 = vector.load %arg2[%c0_1, %c0_2] : memref<4096x128xbf16, #tpu.memory_space<vmem>>, vector<4096x128xbf16>
    %cst = arith.constant dense<0.000000e+00> : vector<16x128xf32>
    %2 = tpu.matmul %0, %1, %cst {dimension_numbers = #tpu.dot_dimension_numbers<[1], [0], [0], [1], [0, 0, 1, 1], [], []>} : vector<16x4096xbf16>, vector<4096x128xbf16>, vector<16x128xf32> -> vector<16x128xf32>
    %c0_3 = arith.constant 0 : index
    %c0_4 = arith.constant 0 : index
    %3 = vector.load %arg3[%c0_3, %c0_4] : memref<1x128xf32, #tpu.memory_space<vmem>>, vector<1x128xf32>
    %4 = vector.broadcast %3 : vector<1x128xf32> to vector<16x128xf32>
    %5 = arith.addf %2, %4 : vector<16x128xf32>
    %c0_5 = arith.constant 0 : index
    %c0_6 = arith.constant 0 : index
    %6 = vector.load %arg4[%c0_5, %c0_6] : memref<16x128xf32, #tpu.memory_space<vmem>>, vector<16x128xf32>
    tpu.vector_store %arg4[%c0_5, %c0_6], %5 {strides = array<i32>} : memref<16x128xf32, #tpu.memory_space<vmem>>, vector<16x128xf32>,
    return
  }
  func.func @transform_0(%arg0: i32) -> (i32, i32) {
    %c0_i32 = arith.constant 0 : i32
    %c0_i32_0 = arith.constant 0 : i32
    return %arg0, %c0_i32 : i32, i32
  }
  func.func @transform_1(%arg0: i32) -> (i32, i32) {
    %c0_i32 = arith.constant 0 : i32
    %c0_i32_0 = arith.constant 0 : i32
    %c0_i32_1 = arith.constant 0 : i32
    return %c0_i32, %c0_i32_0 : i32, i32
  }
  func.func @transform_2(%arg0: i32) -> (i32, i32) {
    %c0_i32 = arith.constant 0 : i32
    %c0_i32_0 = arith.constant 0 : i32
    %c0_i32_1 = arith.constant 0 : i32
    return %c0_i32, %c0_i32_0 : i32, i32
  }
  func.func @transform_3(%arg0: i32) -> (i32, i32) {
    %c0_i32 = arith.constant 0 : i32
    %c0_i32_0 = arith.constant 0 : i32
    return %arg0, %c0_i32 : i32, i32
  }
}

</mosaic_0001>

<bundles_post_ra>
// kernel: object_detection_head.1
= control target key start
LH: loop header
LB: loop body
LE: loop exit
PB: predicated region body
PF: predicated region fallthrough
CT: control target
= control target key end

     0   :  { %8 = vsyncpa [#allocation3], 0  ;;  %s3861_s12 = smov [#allocation2]   ;;  %s3992_s0 = inlined_call_operand.vmem [shape: bf16[16,4096], index: 0, kind: input, shape index: {}]   ;;  %s3993_s1 = inlined_call_operand.hbm [shape: bf16[4096,128], index: 1, kind: input, shape index: {}]   ;;  %s3994_s2 = inlined_call_operand.vmem [shape: f32[1,128], index: 2, kind: input, shape index: {}]   ;;  %s3995_s3 = inlined_call_operand.vmem [shape: f32[16,128], index: 3, kind: output, shape index: {}]  }
   0x1   :  { %s16_s13 = sshll.u32 %s3861_s12, 4  ;;  %s17_s13 = int_to_ptr.vmem [resolvable:$true] %s16_s13 }
   0x2   :  { %s3847_s14 = scalar_lea.vmem %s17_s13, 32768  ;;  %p3852_p1 = scmp.lt.s32.totalorder %s17_s13, %s17_s13 }
   0x3   :  { %p3848_p0 = scmp.ne.s32.totalorder %s17_s13, %s3847_s14  ;;  %p3853_p2 = scmp.lt.s32.totalorder %s3847_s14, %s3847_s14 }
   0x5   :  { %p3854_p3 = por %p3853_p2, %p3852_p1 }
   0x7   :  { %p3855_p4 = pnand %p3854_p3, %p3848_p0 }
   0x9   :  { %3858 = shalt.err (!%p3855_p4)
}
   0xa   :  { %s3862_s15 = smov 64   ;;  %s3863_s16 = smov 4  }
   0xb   :  { %22 = dma.hbm_to_vmem [thread:$0]  %s3993_s1, 32768, %s17_s13, [#allocation3], %s3862_s15, %s3862_s15, %s3863_s16  }
   0xc   :  { %3859 = dma.done.wait [#allocation3], 32768  }
   0xd   :  { %3860 = vsyncadd [#allocation3], 4294934528  ;;  %v3583_v0 = vld [vmem:[#allocation2 + $0x78] sm:$0xff]   ;;  %v3587_v4 = vld [vmem:[#allocation2 + $0x70] sm:$0xff]  }
   0xe   :  { %v3584_v1 = vld [vmem:[#allocation2 + $0xf8] sm:$0xff]   ;;  %3228 = vmatprep.subr.bf16.mxu0 %v3583_v0  ;;  %v3588_v5 = vld [vmem:[#allocation2 + $0xf0] sm:$0xff]   ;;  %v3591_v8 = vld [vmem:[#allocation2 + $0x68] sm:$0xff]  }
   0xf   :  { %v3585_v2 = vld [vmem:[#allocation2 + $0x38] sm:$0xff]   ;;  %3250 = vmatprep.subr.bf16.mxu1 %v3584_v1  ;;  %v3589_v6 = vld [vmem:[#allocation2 + $0x30] sm:$0xff]   ;;  %v3592_v9 = vld [vmem:[#allocation2 + $0xe8] sm:$0xff]  }
  0x10   :  { %v3586_v3 = vld [vmem:[#allocation2 + $0xb8] sm:$0xff]   ;;  %3229 = vmatpush3.bf16.msra.mxu0 %v3585_v2  ;;  %v3590_v7 = vld [vmem:[#allocation2 + $0xb0] sm:$0xff]   ;;  %v3593_v10 = vld [vmem:[#allocation2 + $0x28] sm:$0xff]  }
  0x11   :  { %3251 = vmatpush3.bf16.msra.mxu1 %v3586_v3  ;;  %3230 = vmatprep.subr.bf16.mxu0 %v3587_v4  ;;  %v3594_v11 = vld [vmem:[#allocation2 + $0xa8] sm:$0xff]   ;;  %v3595_v12 = vld [vmem:[#allocation2 + $0x60] sm:$0xff]   ;;  %v3599_v16 = vld [vmem:[#allocation2 + $0x58] sm:$0xff]  }
  0x12   :  { %3252 = vmatprep.subr.bf16.mxu1 %v3588_v5  ;;  %v3596_v13 = vld [vmem:[#allocation2 + $0xe0] sm:$0xff]   ;;  %v3600_v17 = vld [vmem:[#allocation2 + $0xd8] sm:$0xff]   ;;  %v3603_v20 = vld [vmem:[#allocation2 + $0x50] sm:$0xff]  }
  0x13   :  { %v3597_v14 = vld [vmem:[#allocation2 + $0x20] sm:$0xff]   ;;  %v3601_v18 = vld [vmem:[#allocation2 + $0x18] sm:$0xff]   ;;  %v3604_v21 = vld [vmem:[#allocation2 + $0xd0] sm:$0xff]  }
  0x14   :  { %3231 = vmatpush3.bf16.msra.mxu0 %v3589_v6  ;;  %v3598_v15 = vld [vmem:[#allocation2 + $0xa0] sm:$0xff]   ;;  %v3602_v19 = vld [vmem:[#allocation2 + $0x98] sm:$0xff]   ;;  %v3605_v22 = vld [vmem:[#allocation2 + $0x10] sm:$0xff]  }
  0x15   :  { %3253 = vmatpush3.bf16.msra.mxu1 %v3590_v7  ;;  %3232 = vmatprep.subr.bf16.mxu0 %v3591_v8  ;;  %v3606_v23 = vld [vmem:[#allocation2 + $0x90] sm:$0xff]   ;;  %v3607_v24 = vld [vmem:[#allocation2 + $0x48] sm:$0xff]   ;;  %v3611_v28 = vld [vmem:[#allocation2 + $0x40] sm:$0xff]  }
  0x16   :  { %3254 = vmatprep.subr.bf16.mxu1 %v3592_v9  ;;  %v3608_v25 = vld [vmem:[#allocation2 + $0xc8] sm:$0xff]   ;;  %v3612_v29 = vld [vmem:[#allocation2 + $0xc0] sm:$0xff]   ;;  %v3615_v40 = vld [vmem:[#allocation2 + $0x178] sm:$0xff]  }
  0x17   :  { %v3609_v26 = vld [vmem:[#allocation2 + $0x8] sm:$0xff]   ;;  %v3613_v30 = vld [vmem:[#allocation2] sm:$0xff]   ;;  %v3616_v41 = vld [vmem:[#allocation2 + $0x1f8] sm:$0xff]  }
  0x18   :  { %3233 = vmatpush3.bf16.msra.mxu0 %v3593_v10  ;;  %v3610_v27 = vld [vmem:[#allocation2 + $0x88] sm:$0xff]   ;;  %v3614_v31 = vld [vmem:[#allocation2 + $0x80] sm:$0xff]   ;;  %v3617_v42 = vld [vmem:[#allocation2 + $0x138] sm:$0xff]  }
  0x19   :  { %3255 = vmatpush3.bf16.msra.mxu1 %v3594_v11  ;;  %3234 = vmatprep.subr.bf16.mxu0 %v3595_v12  ;;  %v29_v32 = vld [vmem:[%s3992_s0] sm:$0xff]  ;;  %v30_v34 = vld [vmem:[%s3992_s0 + $0x8] sm:$0xff]  ;;  %v3618_v43 = vld [vmem:[#allocation2 + $0x1b8] sm:$0xff]  }
  0x1a   :  { %3256 = vmatprep.subr.bf16.mxu1 %v3596_v13  ;;  %v45_v33 = vld [vmem:[%s3992_s0 + $0x80] sm:$0xff]  ;;  %v46_v37 = vld [vmem:[%s3992_s0 + $0x88] sm:$0xff]  ;;  %v3619_v44 = vld [vmem:[#allocation2 + $0x170] sm:$0xff]  }
  0x1b   :  { %v2940_v35 = vcombine.low %v29_v32, %v45_v33  ;;  %v2941_v36 = vcombine.high %v29_v32, %v45_v33  ;;  %v2942_v38 = vcombine.low %v30_v34, %v46_v37  ;;  %v2943_v39 = vcombine.high %v30_v34, %v46_v37  ;;  %v3620_v45 = vld [vmem:[#allocation2 + $0x1f0] sm:$0xff]   ;;  %v3623_v48 = vld [vmem:[#allocation2 + $0x168] sm:$0xff]   ;;  %v3627_v52 = vld [vmem:[#allocation2 + $0x160] sm:$0xff]  }
  0x1c   :  { %3235 = vmatpush3.bf16.msra.mxu0 %v3597_v14  ;;  %v3621_v46 = vld [vmem:[#allocation2 + $0x130] sm:$0xff]   ;;  %v3624_v49 = vld [vmem:[#allocation2 + $0x1e8] sm:$0xff]   ;;  %v3628_v53 = vld [vmem:[#allocation2 + $0x1e0] sm:$0xff]  }
  0x1d   :  { %3257 = vmatpush3.bf16.msra.mxu1 %v3598_v15  ;;  %3236 = vmatprep.subr.bf16.mxu0 %v3599_v16  ;;  %v3622_v47 = vld [vmem:[#allocation2 + $0x1b0] sm:$0xff]   ;;  %v3625_v50 = vld [vmem:[#allocation2 + $0x128] sm:$0xff]   ;;  %v3629_v54 = vld [vmem:[#allocation2 + $0x120] sm:$0xff]  }
  0x1e   :  { %3258 = vmatprep.subr.bf16.mxu1 %v3600_v17  ;;  %2308 = vmatprep.mubr.bf16.mxu0 %v2941_v36  ;;  %v3626_v51 = vld [vmem:[#allocation2 + $0x1a8] sm:$0xff]   ;;  %v3630_v55 = vld [vmem:[#allocation2 + $0x1a0] sm:$0xff]   ;;  %v3631_v56 = vld [vmem:[#allocation2 + $0x158] sm:$0xff]  }
  0x1f   :  { %2349 = vmatprep.mubr.bf16.mxu1 %v2943_v39  ;;  %v3632_v57 = vld [vmem:[#allocation2 + $0x1d8] sm:$0xff]   ;;  %v3635_v60 = vld [vmem:[#allocation2 + $0x150] sm:$0xff]   ;;  %v3639_v0 = vld [vmem:[#allocation2 + $0x148] sm:$0xff]  }
  0x20   :  { %3237 = vmatpush3.bf16.msra.mxu0 %v3601_v18  ;;  %v3633_v58 = vld [vmem:[#allocation2 + $0x118] sm:$0xff]   ;;  %v3636_v61 = vld [vmem:[#allocation2 + $0x1d0] sm:$0xff]   ;;  %v3640_v1 = vld [vmem:[#allocation2 + $0x1c8] sm:$0xff]  }
  0x21   :  { %3259 = vmatpush3.bf16.msra.mxu1 %v3602_v19  ;;  %3238 = vmatprep.subr.bf16.mxu0 %v3603_v20  ;;  %v3634_v59 = vld [vmem:[#allocation2 + $0x198] sm:$0xff]   ;;  %v3637_v62 = vld [vmem:[#allocation2 + $0x110] sm:$0xff]   ;;  %v3641_v2 = vld [vmem:[#allocation2 + $0x108] sm:$0xff]  }
  0x22   :  { %3260 = vmatprep.subr.bf16.mxu1 %v3604_v21  ;;  %v3638_v63 = vld [vmem:[#allocation2 + $0x190] sm:$0xff]   ;;  %v3642_v3 = vld [vmem:[#allocation2 + $0x188] sm:$0xff]   ;;  %v3643_v4 = vld [vmem:[#allocation2 + $0x140] sm:$0xff]  }
  0x23   :  { %v3644_v5 = vld [vmem:[#allocation2 + $0x1c0] sm:$0xff]   ;;  %v31_v8 = vld [vmem:[%s3992_s0 + $0x10] sm:$0xff]  ;;  %v32_v12 = vld [vmem:[%s3992_s0 + $0x18] sm:$0xff] }
  0x24   :  { %3239 = vmatpush3.bf16.msra.mxu0 %v3605_v22  ;;  %v3645_v6 = vld [vmem:[#allocation2 + $0x100] sm:$0xff]   ;;  %v47_v9 = vld [vmem:[%s3992_s0 + $0x90] sm:$0xff]  ;;  %v48_v13 = vld [vmem:[%s3992_s0 + $0x98] sm:$0xff] }
  0x25   :  { %3261 = vmatpush3.bf16.msra.mxu1 %v3606_v23  ;;  %3240 = vmatprep.subr.bf16.mxu0 %v3607_v24  ;;  %v3646_v7 = vld [vmem:[#allocation2 + $0x180] sm:$0xff]   ;;  %v2944_v10 = vcombine.low %v31_v8, %v47_v9  ;;  %v2945_v11 = vcombine.high %v31_v8, %v47_v9  ;;  %v2946_v14 = vcombine.low %v32_v12, %v48_v13  ;;  %v3647_v16 = vld [vmem:[#allocation2 + $0x278] sm:$0xff]   ;;  %v3651_v20 = vld [vmem:[#allocation2 + $0x270] sm:$0xff]  }
  0x26   :  { %3262 = vmatprep.subr.bf16.mxu1 %v3608_v25  ;;  %v2947_v15 = vcombine.high %v32_v12, %v48_v13  ;;  %v3648_v17 = vld [vmem:[#allocation2 + $0x2f8] sm:$0xff]   ;;  %v3652_v21 = vld [vmem:[#allocation2 + $0x2f0] sm:$0xff]   ;;  %v3655_v24 = vld [vmem:[#allocation2 + $0x268] sm:$0xff]  }
  0x27   :  { %v3649_v18 = vld [vmem:[#allocation2 + $0x238] sm:$0xff]   ;;  %v3653_v22 = vld [vmem:[#allocation2 + $0x230] sm:$0xff]   ;;  %v3656_v25 = vld [vmem:[#allocation2 + $0x2e8] sm:$0xff]  }
  0x28   :  { %3241 = vmatpush3.bf16.msra.mxu0 %v3609_v26  ;;  %v3650_v19 = vld [vmem:[#allocation2 + $0x2b8] sm:$0xff]   ;;  %v3654_v23 = vld [vmem:[#allocation2 + $0x2b0] sm:$0xff]   ;;  %v3657_v26 = vld [vmem:[#allocation2 + $0x228] sm:$0xff]  }
  0x29   :  { %3263 = vmatpush3.bf16.msra.mxu1 %v3610_v27  ;;  %3242 = vmatprep.subr.bf16.mxu0 %v3611_v28  ;;  %v3658_v27 = vld [vmem:[#allocation2 + $0x2a8] sm:$0xff]   ;;  %v3659_v28 = vld [vmem:[#allocation2 + $0x260] sm:$0xff]   ;;  %v3663_v32 = vld [vmem:[#allocation2 + $0x258] sm:$0xff]  }
  0x2a   :  { %3264 = vmatprep.subr.bf16.mxu1 %v3612_v29  ;;  %v3660_v29 = vld [vmem:[#allocation2 + $0x2e0] sm:$0xff]   ;;  %v3664_v33 = vld [vmem:[#allocation2 + $0x2d8] sm:$0xff]   ;;  %v3667_v36 = vld [vmem:[#allocation2 + $0x250] sm:$0xff]  }
  0x2b   :  { %v3665_v34 = vld [vmem:[#allocation2 + $0x218] sm:$0xff]   ;;  %v3668_v37 = vld [vmem:[#allocation2 + $0x2d0] sm:$0xff]  }
  0x2c   :  { %3243 = vmatpush3.bf16.msra.mxu0 %v3613_v30  ;;  %v3661_v30 = vld [vmem:[#allocation2 + $0x220] sm:$0xff]   ;;  %v3670_v39 = vld [vmem:[#allocation2 + $0x290] sm:$0xff]   ;;  %v3695_v8 = vld [vmem:[#allocation2 + $0x358] sm:$0xff]  }
  0x2d   :  { %3265 = vmatpush3.bf16.msra.mxu1 %v3614_v31  ;;  %3272 = vmatprep.subr.bf16.mxu0 %v3615_v40  ;;  %v3662_v31 = vld [vmem:[#allocation2 + $0x2a0] sm:$0xff]   ;;  %v3671_v40 = vld [vmem:[#allocation2 + $0x248] sm:$0xff]   ;;  %v3696_v9 = vld [vmem:[#allocation2 + $0x3d8] sm:$0xff]  }
  0x2e   :  { %3294 = vmatprep.subr.bf16.mxu1 %v3616_v41  ;;  %v3672_v41 = vld [vmem:[#allocation2 + $0x2c8] sm:$0xff]   ;;  %v3699_v12 = vld [vmem:[#allocation2 + $0x350] sm:$0xff]  }
  0x2f   :  { %2309 = vmatmul.mubr.bf16.vlgmr.msra.gmra.mxu0 %v2940_v35  ;;  %v3666_v35 = vld [vmem:[#allocation2 + $0x298] sm:$0xff]   ;;  %v3700_v13 = vld [vmem:[#allocation2 + $0x3d0] sm:$0xff]  }
  0x30   :  { %2350 = vmatmul.mubr.bf16.vlgmr.msra.gmra.mxu1 %v2942_v38  ;;  %3273 = vmatpush3.bf16.msra.mxu0 %v3617_v42  ;;  %v3669_v38 = vld [vmem:[#allocation2 + $0x210] sm:$0xff]   ;;  %v3673_v42 = vld [vmem:[#allocation2 + $0x208] sm:$0xff]  }
  0x31   :  { %3295 = vmatpush3.bf16.msra.mxu1 %v3618_v43  ;;  %3274 = vmatprep.subr.bf16.mxu0 %v3619_v44  ;;  %v3674_v43 = vld [vmem:[#allocation2 + $0x288] sm:$0xff]   ;;  %v3675_v44 = vld [vmem:[#allocation2 + $0x240] sm:$0xff]  }
  0x32   :  { %3296 = vmatprep.subr.bf16.mxu1 %v3620_v45  ;;  %2390 = vmatprep.mubr.bf16.mxu0 %v2945_v11  ;;  %v3676_v45 = vld [vmem:[#allocation2 + $0x2c0] sm:$0xff]   ;;  %v3698_v11 = vld [vmem:[#allocation2 + $0x398] sm:$0xff]  }
  0x33   :  { %2431 = vmatprep.mubr.bf16.mxu1 %v2947_v15  ;;  %v3702_v15 = vld [vmem:[#allocation2 + $0x390] sm:$0xff]  }
  0x34   :  { %3275 = vmatpush3.bf16.msra.mxu0 %v3621_v46  ;;  %v3677_v46 = vld [vmem:[#allocation2 + $0x200] sm:$0xff]  }
  0x35   :  { %3297 = vmatpush3.bf16.msra.mxu1 %v3622_v47  ;;  %3276 = vmatprep.subr.bf16.mxu0 %v3623_v48  ;;  %v3678_v47 = vld [vmem:[#allocation2 + $0x280] sm:$0xff]  }
  0x36   :  { %3298 = vmatprep.subr.bf16.mxu1 %v3624_v49  ;;  %v33_v48 = vld [vmem:[%s3992_s0 + $0x20] sm:$0xff] }
  0x37   :  { %v49_v49 = vld [vmem:[%s3992_s0 + $0xa0] sm:$0xff] }
  0x38   :  { %3277 = vmatpush3.bf16.msra.mxu0 %v3625_v50  ;;  %v34_v50 = vld [vmem:[%s3992_s0 + $0x28] sm:$0xff] }
  0x39   :  { %3299 = vmatpush3.bf16.msra.mxu1 %v3626_v51  ;;  %3278 = vmatprep.subr.bf16.mxu0 %v3627_v52  ;;  %v50_v51 = vld [vmem:[%s3992_s0 + $0xa8] sm:$0xff]  ;;  %v2948_v52 = vcombine.low %v33_v48, %v49_v49 }
  0x3a   :  { %3300 = vmatprep.subr.bf16.mxu1 %v3628_v53  ;;  %v2949_v53 = vcombine.high %v33_v48, %v49_v49  ;;  %v3727_v48 = vld [vmem:[#allocation2 + $0x458] sm:$0xff]  }
  0x3b   :  { %v3728_v49 = vld [vmem:[#allocation2 + $0x4d8] sm:$0xff]  }
  0x3c   :  { %3279 = vmatpush3.bf16.msra.mxu0 %v3629_v54  ;;  %v2950_v54 = vcombine.low %v34_v50, %v50_v51 }
  0x3d   :  { %3301 = vmatpush3.bf16.msra.mxu1 %v3630_v55  ;;  %3280 = vmatprep.subr.bf16.mxu0 %v3631_v56  ;;  %v2951_v55 = vcombine.high %v34_v50, %v50_v51  ;;  %v3679_v56 = vld [vmem:[#allocation2 + $0x378] sm:$0xff]  }
  0x3e   :  { %3302 = vmatprep.subr.bf16.mxu1 %v3632_v57  ;;  %v3680_v57 = vld [vmem:[#allocation2 + $0x3f8] sm:$0xff]  }
  0x3f   :  { %v3729_v50 = vld [vmem:[#allocation2 + $0x418] sm:$0xff]  }
  0x40   :  { %3281 = vmatpush3.bf16.msra.mxu0 %v3633_v58  ;;  %v3681_v58 = vld [vmem:[#allocation2 + $0x338] sm:$0xff]  }
  0x41   :  { %3303 = vmatpush3.bf16.msra.mxu1 %v3634_v59  ;;  %3282 = vmatprep.subr.bf16.mxu0 %v3635_v60  ;;  %v3682_v59 = vld [vmem:[#allocation2 + $0x3b8] sm:$0xff]   ;;  %v3683_v60 = vld [vmem:[#allocation2 + $0x370] sm:$0xff]  }
  0x42   :  { %3304 = vmatprep.subr.bf16.mxu1 %v3636_v61  ;;  %v3684_v61 = vld [vmem:[#allocation2 + $0x3f0] sm:$0xff]   ;;  %v3730_v51 = vld [vmem:[#allocation2 + $0x498] sm:$0xff]  }
  0x44   :  { %3283 = vmatpush3.bf16.msra.mxu0 %v3637_v62  ;;  %v3685_v62 = vld [vmem:[#allocation2 + $0x330] sm:$0xff]  }
  0x45   :  { %3305 = vmatpush3.bf16.msra.mxu1 %v3638_v63  ;;  %3284 = vmatprep.subr.bf16.mxu0 %v3639_v0  ;;  %v3686_v63 = vld [vmem:[#allocation2 + $0x3b0] sm:$0xff]   ;;  %v3687_v0 = vld [vmem:[#allocation2 + $0x368] sm:$0xff]  }
  0x46   :  { %3306 = vmatprep.subr.bf16.mxu1 %v3640_v1  ;;  %v3688_v1 = vld [vmem:[#allocation2 + $0x3e8] sm:$0xff]  }
  0x48   :  { %3285 = vmatpush3.bf16.msra.mxu0 %v3641_v2  ;;  %v3689_v2 = vld [vmem:[#allocation2 + $0x328] sm:$0xff]  }
  0x49   :  { %3307 = vmatpush3.bf16.msra.mxu1 %v3642_v3  ;;  %3286 = vmatprep.subr.bf16.mxu0 %v3643_v4  ;;  %v3690_v3 = vld [vmem:[#allocation2 + $0x3a8] sm:$0xff]   ;;  %v3691_v4 = vld [vmem:[#allocation2 + $0x360] sm:$0xff]  }
  0x4a   :  { %3308 = vmatprep.subr.bf16.mxu1 %v3644_v5  ;;  %v3692_v5 = vld [vmem:[#allocation2 + $0x3e0] sm:$0xff]  }
  0x4c   :  { %3287 = vmatpush3.bf16.msra.mxu0 %v3645_v6  ;;  %v3693_v6 = vld [vmem:[#allocation2 + $0x320] sm:$0xff]  }
  0x4d   :  { %3309 = vmatpush3.bf16.msra.mxu1 %v3646_v7  ;;  %3316 = vmatprep.subr.bf16.mxu0 %v3647_v16  ;;  %v3694_v7 = vld [vmem:[#allocation2 + $0x3a0] sm:$0xff]   ;;  %v3703_v16 = vld [vmem:[#allocation2 + $0x348] sm:$0xff]  }
  0x4e   :  { %3338 = vmatprep.subr.bf16.mxu1 %v3648_v17  ;;  %v3704_v17 = vld [vmem:[#allocation2 + $0x3c8] sm:$0xff]  }
  0x4f   :  { %2391 = vmatmul.mubr.bf16.vlgmr.msra.gmra.mxu0 %v2944_v10  ;;  %v3697_v10 = vld [vmem:[#allocation2 + $0x318] sm:$0xff]  }
  0x50   :  { %2432 = vmatmul.mubr.bf16.vlgmr.msra.gmra.mxu1 %v2946_v14  ;;  %3317 = vmatpush3.bf16.msra.mxu0 %v3649_v18  ;;  %v3701_v14 = vld [vmem:[#allocation2 + $0x310] sm:$0xff]   ;;  %v3705_v18 = vld [vmem:[#allocation2 + $0x308] sm:$0xff]  }
  0x51   :  { %3339 = vmatpush3.bf16.msra.mxu1 %v3650_v19  ;;  %3318 = vmatprep.subr.bf16.mxu0 %v3651_v20  ;;  %v3706_v19 = vld [vmem:[#allocation2 + $0x388] sm:$0xff]   ;;  %v3707_v20 = vld [vmem:[#allocation2 + $0x340] sm:$0xff]  }
  0x52   :  { %3340 = vmatprep.subr.bf16.mxu1 %v3652_v21  ;;  %2472 = vmatprep.mubr.bf16.mxu0 %v2949_v53  ;;  %v3708_v21 = vld [vmem:[#allocation2 + $0x3c0] sm:$0xff]   ;;  %v3732_v53 = vld [vmem:[#allocation2 + $0x4d0] sm:$0xff]  }
  0x53   :  { %2513 = vmatprep.mubr.bf16.mxu1 %v2951_v55  ;;  %v3734_v55 = vld [vmem:[#allocation2 + $0x490] sm:$0xff]  }
  0x54   :  { %3319 = vmatpush3.bf16.msra.mxu0 %v3653_v22  ;;  %v3709_v22 = vld [vmem:[#allocation2 + $0x300] sm:$0xff]  }
  0x55   :  { %3341 = vmatpush3.bf16.msra.mxu1 %v3654_v23  ;;  %3320 = vmatprep.subr.bf16.mxu0 %v3655_v24  ;;  %v3710_v23 = vld [vmem:[#allocation2 + $0x380] sm:$0xff]   ;;  %v35_v24 = vld [vmem:[%s3992_s0 + $0x30] sm:$0xff] }
  0x56   :  { %3342 = vmatprep.subr.bf16.mxu1 %v3656_v25  ;;  %v51_v25 = vld [vmem:[%s3992_s0 + $0xb0] sm:$0xff] }
  0x58   :  { %3321 = vmatpush3.bf16.msra.mxu0 %v3657_v26  ;;  %v36_v26 = vld [vmem:[%s3992_s0 + $0x38] sm:$0xff] }
  0x59   :  { %3343 = vmatpush3.bf16.msra.mxu1 %v3658_v27  ;;  %3322 = vmatprep.subr.bf16.mxu0 %v3659_v28  ;;  %v2952_v27 = vcombine.low %v35_v24, %v51_v25  ;;  %v2953_v28 = vcombine.high %v35_v24, %v51_v25  ;;  %v3759_v24 = vld [vmem:[#allocation2 + $0x558] sm:$0xff]  }
  0x5a   :  { %3344 = vmatprep.subr.bf16.mxu1 %v3660_v29  ;;  %v52_v29 = vld [vmem:[%s3992_s0 + $0xb8] sm:$0xff] }
  0x5b   :  { %v3760_v25 = vld [vmem:[#allocation2 + $0x5d8] sm:$0xff]  }
  0x5c   :  { %3323 = vmatpush3.bf16.msra.mxu0 %v3661_v30  ;;  %v2954_v30 = vcombine.low %v36_v26, %v52_v29 }
  0x5d   :  { %3345 = vmatpush3.bf16.msra.mxu1 %v3662_v31  ;;  %3324 = vmatprep.subr.bf16.mxu0 %v3663_v32  ;;  %v2955_v31 = vcombine.high %v36_v26, %v52_v29  ;;  %v3711_v32 = vld [vmem:[#allocation2 + $0x478] sm:$0xff]   ;;  %v3764_v29 = vld [vmem:[#allocation2 + $0x5d0] sm:$0xff]  }
  0x5e   :  { %3346 = vmatprep.subr.bf16.mxu1 %v3664_v33  ;;  %v3712_v33 = vld [vmem:[#allocation2 + $0x4f8] sm:$0xff]  }
  0x5f   :  { %v3761_v26 = vld [vmem:[#allocation2 + $0x518] sm:$0xff]  }
  0x60   :  { %3325 = vmatpush3.bf16.msra.mxu0 %v3665_v34  ;;  %v3713_v34 = vld [vmem:[#allocation2 + $0x438] sm:$0xff]  }
  0x61   :  { %3347 = vmatpush3.bf16.msra.mxu1 %v3666_v35  ;;  %3326 = vmatprep.subr.bf16.mxu0 %v3667_v36  ;;  %v3714_v35 = vld [vmem:[#allocation2 + $0x4b8] sm:$0xff]   ;;  %v3715_v36 = vld [vmem:[#allocation2 + $0x470] sm:$0xff]  }
  0x62   :  { %3348 = vmatprep.subr.bf16.mxu1 %v3668_v37  ;;  %v3716_v37 = vld [vmem:[#allocation2 + $0x4f0] sm:$0xff]  }
  0x64   :  { %3327 = vmatpush3.bf16.msra.mxu0 %v3669_v38  ;;  %v3717_v38 = vld [vmem:[#allocation2 + $0x430] sm:$0xff]  }
  0x65   :  { %3349 = vmatpush3.bf16.msra.mxu1 %v3670_v39  ;;  %3328 = vmatprep.subr.bf16.mxu0 %v3671_v40  ;;  %v3718_v39 = vld [vmem:[#allocation2 + $0x4b0] sm:$0xff]   ;;  %v3719_v40 = vld [vmem:[#allocation2 + $0x468] sm:$0xff]  }
  0x66   :  { %3350 = vmatprep.subr.bf16.mxu1 %v3672_v41  ;;  %v3720_v41 = vld [vmem:[#allocation2 + $0x4e8] sm:$0xff]  }
  0x68   :  { %3329 = vmatpush3.bf16.msra.mxu0 %v3673_v42  ;;  %v3721_v42 = vld [vmem:[#allocation2 + $0x428] sm:$0xff]  }
  0x69   :  { %3351 = vmatpush3.bf16.msra.mxu1 %v3674_v43  ;;  %3330 = vmatprep.subr.bf16.mxu0 %v3675_v44  ;;  %v3722_v43 = vld [vmem:[#allocation2 + $0x4a8] sm:$0xff]   ;;  %v3723_v44 = vld [vmem:[#allocation2 + $0x460] sm:$0xff]  }
  0x6a   :  { %3352 = vmatprep.subr.bf16.mxu1 %v3676_v45  ;;  %v3724_v45 = vld [vmem:[#allocation2 + $0x4e0] sm:$0xff]  }
  0x6c   :  { %3331 = vmatpush3.bf16.msra.mxu0 %v3677_v46  ;;  %v3725_v46 = vld [vmem:[#allocation2 + $0x420] sm:$0xff]  }
  0x6d   :  { %3353 = vmatpush3.bf16.msra.mxu1 %v3678_v47  ;;  %3360 = vmatprep.subr.bf16.mxu0 %v3679_v56  ;;  %v3726_v47 = vld [vmem:[#allocation2 + $0x4a0] sm:$0xff]   ;;  %v3735_v56 = vld [vmem:[#allocation2 + $0x448] sm:$0xff]  }
  0x6e   :  { %3382 = vmatprep.subr.bf16.mxu1 %v3680_v57  ;;  %v3736_v57 = vld [vmem:[#allocation2 + $0x4c8] sm:$0xff]  }
  0x6f   :  { %2473 = vmatmul.mubr.bf16.vlgmr.msra.gmra.mxu0 %v2948_v52  ;;  %v3731_v52 = vld [vmem:[#allocation2 + $0x450] sm:$0xff]  }
  0x70   :  { %2514 = vmatmul.mubr.bf16.vlgmr.msra.gmra.mxu1 %v2950_v54  ;;  %3361 = vmatpush3.bf16.msra.mxu0 %v3681_v58  ;;  %v3733_v54 = vld [vmem:[#allocation2 + $0x410] sm:$0xff]   ;;  %v3737_v58 = vld [vmem:[#allocation2 + $0x408] sm:$0xff]  }
  0x71   :  { %3383 = vmatpush3.bf16.msra.mxu1 %v3682_v59  ;;  %3362 = vmatprep.subr.bf16.mxu0 %v3683_v60  ;;  %v3738_v59 = vld [vmem:[#allocation2 + $0x488] sm:$0xff]   ;;  %v3739_v60 = vld [vmem:[#allocation2 + $0x440] sm:$0xff]  }
  0x72   :  { %3384 = vmatprep.subr.bf16.mxu1 %v3684_v61  ;;  %2554 = vmatprep.mubr.bf16.mxu0 %v2953_v28  ;;  %v3740_v61 = vld [vmem:[#allocation2 + $0x4c0] sm:$0xff]   ;;  %v3763_v28 = vld [vmem:[#allocation2 + $0x550] sm:$0xff]  }
  0x73   :  { %2595 = vmatprep.mubr.bf16.mxu1 %v2955_v31  ;;  %v3766_v31 = vld [vmem:[#allocation2 + $0x590] sm:$0xff]  }
  0x74   :  { %3363 = vmatpush3.bf16.msra.mxu0 %v3685_v62  ;;  %v3741_v62 = vld [vmem:[#allocation2 + $0x400] sm:$0xff]  }
  0x75   :  { %3385 = vmatpush3.bf16.msra.mxu1 %v3686_v63  ;;  %3364 = vmatprep.subr.bf16.mxu0 %v3687_v0  ;;  %v3742_v63 = vld [vmem:[#allocation2 + $0x480] sm:$0xff]  }
  0x76   :  { %3386 = vmatprep.subr.bf16.mxu1 %v3688_v1  ;;  %v37_v0 = vld [vmem:[%s3992_s0 + $0x40] sm:$0xff] }
  0x77   :  { %v53_v1 = vld [vmem:[%s3992_s0 + $0xc0] sm:$0xff] }
  0x78   :  { %3365 = vmatpush3.bf16.msra.mxu0 %v3689_v2  ;;  %v2956_v2 = vcombine.low %v37_v0, %v53_v1 }
  0x79   :  { %3387 = vmatpush3.bf16.msra.mxu1 %v3690_v3  ;;  %3366 = vmatprep.subr.bf16.mxu0 %v3691_v4  ;;  %v2957_v3 = vcombine.high %v37_v0, %v53_v1  ;;  %v38_v4 = vld [vmem:[%s3992_s0 + $0x48] sm:$0xff]  ;;  %v3791_v0 = vld [vmem:[#allocation2 + $0x658] sm:$0xff]  }
  0x7a   :  { %3388 = vmatprep.subr.bf16.mxu1 %v3692_v5  ;;  %v54_v5 = vld [vmem:[%s3992_s0 + $0xc8] sm:$0xff]  ;;  %v3792_v1 = vld [vmem:[#allocation2 + $0x6d8] sm:$0xff]  }
  0x7c   :  { %3367 = vmatpush3.bf16.msra.mxu0 %v3693_v6  ;;  %v2958_v6 = vcombine.low %v38_v4, %v54_v5 }
  0x7d   :  { %3389 = vmatpush3.bf16.msra.mxu1 %v3694_v7  ;;  %3368 = vmatprep.subr.bf16.mxu0 %v3695_v8  ;;  %v2959_v7 = vcombine.high %v38_v4, %v54_v5  ;;  %v3743_v8 = vld [vmem:[#allocation2 + $0x578] sm:$0xff]   ;;  %v3795_v4 = vld [vmem:[#allocation2 + $0x650] sm:$0xff]  }
  0x7e   :  { %3390 = vmatprep.subr.bf16.mxu1 %v3696_v9  ;;  %v3744_v9 = vld [vmem:[#allocation2 + $0x5f8] sm:$0xff]   ;;  %v3796_v5 = vld [vmem:[#allocation2 + $0x6d0] sm:$0xff]  }
  0x80   :  { %3369 = vmatpush3.bf16.msra.mxu0 %v3697_v10  ;;  %v3745_v10 = vld [vmem:[#allocation2 + $0x538] sm:$0xff]  }
  0x81   :  { %3391 = vmatpush3.bf16.msra.mxu1 %v3698_v11  ;;  %3370 = vmatprep.subr.bf16.mxu0 %v3699_v12  ;;  %v3746_v11 = vld [vmem:[#allocation2 + $0x5b8] sm:$0xff]   ;;  %v3747_v12 = vld [vmem:[#allocation2 + $0x570] sm:$0xff]  }
  0x82   :  { %3392 = vmatprep.subr.bf16.mxu1 %v3700_v13  ;;  %v3748_v13 = vld [vmem:[#allocation2 + $0x5f0] sm:$0xff]  }
  0x84   :  { %3371 = vmatpush3.bf16.msra.mxu0 %v3701_v14  ;;  %v3749_v14 = vld [vmem:[#allocation2 + $0x530] sm:$0xff]  }
  0x85   :  { %3393 = vmatpush3.bf16.msra.mxu1 %v3702_v15  ;;  %3372 = vmatprep.subr.bf16.mxu0 %v3703_v16  ;;  %v3750_v15 = vld [vmem:[#allocation2 + $0x5b0] sm:$0xff]   ;;  %v3751_v16 = vld [vmem:[#allocation2 + $0x568] sm:$0xff]  }
  0x86   :  { %3394 = vmatprep.subr.bf16.mxu1 %v3704_v17  ;;  %v3752_v17 = vld [vmem:[#allocation2 + $0x5e8] sm:$0xff]  }
  0x88   :  { %3373 = vmatpush3.bf16.msra.mxu0 %v3705_v18  ;;  %v3753_v18 = vld [vmem:[#allocation2 + $0x528] sm:$0xff]  }
  0x89   :  { %3395 = vmatpush3.bf16.msra.mxu1 %v3706_v19  ;;  %3374 = vmatprep.subr.bf16.mxu0 %v3707_v20  ;;  %v3754_v19 = vld [vmem:[#allocation2 + $0x5a8] sm:$0xff]   ;;  %v3755_v20 = vld [vmem:[#allocation2 + $0x560] sm:$0xff]  }
  0x8a   :  { %3396 = vmatprep.subr.bf16.mxu1 %v3708_v21  ;;  %v3756_v21 = vld [vmem:[#allocation2 + $0x5e0] sm:$0xff]  }
  0x8c   :  { %3375 = vmatpush3.bf16.msra.mxu0 %v3709_v22  ;;  %v3757_v22 = vld [vmem:[#allocation2 + $0x520] sm:$0xff]  }
  0x8d   :  { %3397 = vmatpush3.bf16.msra.mxu1 %v3710_v23  ;;  %3404 = vmatprep.subr.bf16.mxu0 %v3711_v32  ;;  %v3758_v23 = vld [vmem:[#allocation2 + $0x5a0] sm:$0xff]   ;;  %v3767_v32 = vld [vmem:[#allocation2 + $0x548] sm:$0xff]  }
  0x8e   :  { %3426 = vmatprep.subr.bf16.mxu1 %v3712_v33  ;;  %v3768_v33 = vld [vmem:[#allocation2 + $0x5c8] sm:$0xff]  }
  0x8f   :  { %2555 = vmatmul.mubr.bf16.vlgmr.msra.gmra.mxu0 %v2952_v27  ;;  %v3762_v27 = vld [vmem:[#allocation2 + $0x598] sm:$0xff]  }
  0x90   :  { %2596 = vmatmul.mubr.bf16.vlgmr.msra.gmra.mxu1 %v2954_v30  ;;  %3405 = vmatpush3.bf16.msra.mxu0 %v3713_v34  ;;  %v3765_v30 = vld [vmem:[#allocation2 + $0x510] sm:$0xff]   ;;  %v3769_v34 = vld [vmem:[#allocation2 + $0x508] sm:$0xff]  }
  0x91   :  { %3427 = vmatpush3.bf16.msra.mxu1 %v3714_v35  ;;  %3406 = vmatprep.subr.bf16.mxu0 %v3715_v36  ;;  %v3770_v35 = vld [vmem:[#allocation2 + $0x588] sm:$0xff]   ;;  %v3771_v36 = vld [vmem:[#allocation2 + $0x540] sm:$0xff]  }
  0x92   :  { %3428 = vmatprep.subr.bf16.mxu1 %v3716_v37  ;;  %2636 = vmatprep.mubr.bf16.mxu0 %v2957_v3  ;;  %v3772_v37 = vld [vmem:[#allocation2 + $0x5c0] sm:$0xff]   ;;  %v3794_v3 = vld [vmem:[#allocation2 + $0x698] sm:$0xff]  }
  0x93   :  { %2677 = vmatprep.mubr.bf16.mxu1 %v2959_v7  ;;  %v3798_v7 = vld [vmem:[#allocation2 + $0x690] sm:$0xff]  }
  0x94   :  { %3407 = vmatpush3.bf16.msra.mxu0 %v3717_v38  ;;  %v3773_v38 = vld [vmem:[#allocation2 + $0x500] sm:$0xff]  }
  0x95   :  { %3429 = vmatpush3.bf16.msra.mxu1 %v3718_v39  ;;  %3408 = vmatprep.subr.bf16.mxu0 %v3719_v40  ;;  %v3774_v39 = vld [vmem:[#allocation2 + $0x580] sm:$0xff]   ;;  %v39_v40 = vld [vmem:[%s3992_s0 + $0x50] sm:$0xff] }
  0x96   :  { %3430 = vmatprep.subr.bf16.mxu1 %v3720_v41  ;;  %v55_v41 = vld [vmem:[%s3992_s0 + $0xd0] sm:$0xff] }
  0x98   :  { %3409 = vmatpush3.bf16.msra.mxu0 %v3721_v42  ;;  %v40_v42 = vld [vmem:[%s3992_s0 + $0x58] sm:$0xff] }
  0x99   :  { %3431 = vmatpush3.bf16.msra.mxu1 %v3722_v43  ;;  %3410 = vmatprep.subr.bf16.mxu0 %v3723_v44  ;;  %v56_v43 = vld [vmem:[%s3992_s0 + $0xd8] sm:$0xff]  ;;  %v2960_v44 = vcombine.low %v39_v40, %v55_v41 }
  0x9a   :  { %3432 = vmatprep.subr.bf16.mxu1 %v3724_v45  ;;  %v2961_v45 = vcombine.high %v39_v40, %v55_v41  ;;  %v3823_v40 = vld [vmem:[#allocation2 + $0x758] sm:$0xff]  }
  0x9b   :  { %v3824_v41 = vld [vmem:[#allocation2 + $0x7d8] sm:$0xff]  }
  0x9c   :  { %3411 = vmatpush3.bf16.msra.mxu0 %v3725_v46  ;;  %v2962_v46 = vcombine.low %v40_v42, %v56_v43 }
  0x9d   :  { %3433 = vmatpush3.bf16.msra.mxu1 %v3726_v47  ;;  %3412 = vmatprep.subr.bf16.mxu0 %v3727_v48  ;;  %v2963_v47 = vcombine.high %v40_v42, %v56_v43  ;;  %v3775_v48 = vld [vmem:[#allocation2 + $0x678] sm:$0xff]  }
  0x9e   :  { %3434 = vmatprep.subr.bf16.mxu1 %v3728_v49  ;;  %v3776_v49 = vld [vmem:[#allocation2 + $0x6f8] sm:$0xff]  }
  0x9f   :  { %v3825_v42 = vld [vmem:[#allocation2 + $0x718] sm:$0xff]  }
  0xa0   :  { %3413 = vmatpush3.bf16.msra.mxu0 %v3729_v50  ;;  %v3777_v50 = vld [vmem:[#allocation2 + $0x638] sm:$0xff]  }
  0xa1   :  { %3435 = vmatpush3.bf16.msra.mxu1 %v3730_v51  ;;  %3414 = vmatprep.subr.bf16.mxu0 %v3731_v52  ;;  %v3778_v51 = vld [vmem:[#allocation2 + $0x6b8] sm:$0xff]   ;;  %v3779_v52 = vld [vmem:[#allocation2 + $0x670] sm:$0xff]  }
  0xa2   :  { %3436 = vmatprep.subr.bf16.mxu1 %v3732_v53  ;;  %v3780_v53 = vld [vmem:[#allocation2 + $0x6f0] sm:$0xff]   ;;  %v3826_v43 = vld [vmem:[#allocation2 + $0x798] sm:$0xff]  }
  0xa4   :  { %3415 = vmatpush3.bf16.msra.mxu0 %v3733_v54  ;;  %v3781_v54 = vld [vmem:[#allocation2 + $0x630] sm:$0xff]  }
  0xa5   :  { %3437 = vmatpush3.bf16.msra.mxu1 %v3734_v55  ;;  %3416 = vmatprep.subr.bf16.mxu0 %v3735_v56  ;;  %v3782_v55 = vld [vmem:[#allocation2 + $0x6b0] sm:$0xff]   ;;  %v3783_v56 = vld [vmem:[#allocation2 + $0x668] sm:$0xff]  }
  0xa6   :  { %3438 = vmatprep.subr.bf16.mxu1 %v3736_v57  ;;  %v3784_v57 = vld [vmem:[#allocation2 + $0x6e8] sm:$0xff]  }
  0xa8   :  { %3417 = vmatpush3.bf16.msra.mxu0 %v3737_v58  ;;  %v3785_v58 = vld [vmem:[#allocation2 + $0x628] sm:$0xff]  }
  0xa9   :  { %3439 = vmatpush3.bf16.msra.mxu1 %v3738_v59  ;;  %3418 = vmatprep.subr.bf16.mxu0 %v3739_v60  ;;  %v3786_v59 = vld [vmem:[#allocation2 + $0x6a8] sm:$0xff]   ;;  %v3787_v60 = vld [vmem:[#allocation2 + $0x660] sm:$0xff]  }
  0xaa   :  { %3440 = vmatprep.subr.bf16.mxu1 %v3740_v61  ;;  %v3788_v61 = vld [vmem:[#allocation2 + $0x6e0] sm:$0xff]  }
  0xac   :  { %3419 = vmatpush3.bf16.msra.mxu0 %v3741_v62  ;;  %v3789_v62 = vld [vmem:[#allocation2 + $0x620] sm:$0xff]  }
  0xad   :  { %3441 = vmatpush3.bf16.msra.mxu1 %v3742_v63  ;;  %3448 = vmatprep.subr.bf16.mxu0 %v3743_v8  ;;  %v3790_v63 = vld [vmem:[#allocation2 + $0x6a0] sm:$0xff]   ;;  %v3799_v8 = vld [vmem:[#allocation2 + $0x648] sm:$0xff]  }
  0xae   :  { %3470 = vmatprep.subr.bf16.mxu1 %v3744_v9  ;;  %v3800_v9 = vld [vmem:[#allocation2 + $0x6c8] sm:$0xff]  }
  0xaf   :  { %2637 = vmatmul.mubr.bf16.vlgmr.msra.gmra.mxu0 %v2956_v2  ;;  %v3793_v2 = vld [vmem:[#allocation2 + $0x618] sm:$0xff]  }
  0xb0   :  { %2678 = vmatmul.mubr.bf16.vlgmr.msra.gmra.mxu1 %v2958_v6  ;;  %3449 = vmatpush3.bf16.msra.mxu0 %v3745_v10  ;;  %v3797_v6 = vld [vmem:[#allocation2 + $0x610] sm:$0xff]   ;;  %v3801_v10 = vld [vmem:[#allocation2 + $0x608] sm:$0xff]  }
  0xb1   :  { %3471 = vmatpush3.bf16.msra.mxu1 %v3746_v11  ;;  %3450 = vmatprep.subr.bf16.mxu0 %v3747_v12  ;;  %v3802_v11 = vld [vmem:[#allocation2 + $0x688] sm:$0xff]   ;;  %v3803_v12 = vld [vmem:[#allocation2 + $0x640] sm:$0xff]  }
  0xb2   :  { %3472 = vmatprep.subr.bf16.mxu1 %v3748_v13  ;;  %2718 = vmatprep.mubr.bf16.mxu0 %v2961_v45  ;;  %v3804_v13 = vld [vmem:[#allocation2 + $0x6c0] sm:$0xff]   ;;  %v3828_v45 = vld [vmem:[#allocation2 + $0x7d0] sm:$0xff]  }
  0xb3   :  { %2759 = vmatprep.mubr.bf16.mxu1 %v2963_v47  ;;  %v3830_v47 = vld [vmem:[#allocation2 + $0x790] sm:$0xff]  }
  0xb4   :  { %3451 = vmatpush3.bf16.msra.mxu0 %v3749_v14  ;;  %v3805_v14 = vld [vmem:[#allocation2 + $0x600] sm:$0xff]  }
  0xb5   :  { %3473 = vmatpush3.bf16.msra.mxu1 %v3750_v15  ;;  %3452 = vmatprep.subr.bf16.mxu0 %v3751_v16  ;;  %v3806_v15 = vld [vmem:[#allocation2 + $0x680] sm:$0xff]  }
  0xb6   :  { %3474 = vmatprep.subr.bf16.mxu1 %v3752_v17  ;;  %v41_v16 = vld [vmem:[%s3992_s0 + $0x60] sm:$0xff] }
  0xb7   :  { %v57_v17 = vld [vmem:[%s3992_s0 + $0xe0] sm:$0xff] }
  0xb8   :  { %3453 = vmatpush3.bf16.msra.mxu0 %v3753_v18  ;;  %v42_v18 = vld [vmem:[%s3992_s0 + $0x68] sm:$0xff] }
  0xb9   :  { %3475 = vmatpush3.bf16.msra.mxu1 %v3754_v19  ;;  %3454 = vmatprep.subr.bf16.mxu0 %v3755_v20  ;;  %v2964_v19 = vcombine.low %v41_v16, %v57_v17  ;;  %v2965_v20 = vcombine.high %v41_v16, %v57_v17 }
  0xba   :  { %3476 = vmatprep.subr.bf16.mxu1 %v3756_v21  ;;  %v58_v21 = vld [vmem:[%s3992_s0 + $0xe8] sm:$0xff] }
  0xbc   :  { %3455 = vmatpush3.bf16.msra.mxu0 %v3757_v22  ;;  %v2966_v22 = vcombine.low %v42_v18, %v58_v21 }
  0xbd   :  { %3477 = vmatpush3.bf16.msra.mxu1 %v3758_v23  ;;  %3456 = vmatprep.subr.bf16.mxu0 %v3759_v24  ;;  %v2967_v23 = vcombine.high %v42_v18, %v58_v21  ;;  %v3807_v24 = vld [vmem:[#allocation2 + $0x778] sm:$0xff]  }
  0xbe   :  { %3478 = vmatprep.subr.bf16.mxu1 %v3760_v25  ;;  %v3808_v25 = vld [vmem:[#allocation2 + $0x7f8] sm:$0xff]  }
  0xc0   :  { %3457 = vmatpush3.bf16.msra.mxu0 %v3761_v26  ;;  %v3809_v26 = vld [vmem:[#allocation2 + $0x738] sm:$0xff]  }
  0xc1   :  { %3479 = vmatpush3.bf16.msra.mxu1 %v3762_v27  ;;  %3458 = vmatprep.subr.bf16.mxu0 %v3763_v28  ;;  %v3810_v27 = vld [vmem:[#allocation2 + $0x7b8] sm:$0xff]   ;;  %v3811_v28 = vld [vmem:[#allocation2 + $0x770] sm:$0xff]  }
  0xc2   :  { %3480 = vmatprep.subr.bf16.mxu1 %v3764_v29  ;;  %v3812_v29 = vld [vmem:[#allocation2 + $0x7f0] sm:$0xff]  }
  0xc4   :  { %3459 = vmatpush3.bf16.msra.mxu0 %v3765_v30  ;;  %v3813_v30 = vld [vmem:[#allocation2 + $0x730] sm:$0xff]  }
  0xc5   :  { %3481 = vmatpush3.bf16.msra.mxu1 %v3766_v31  ;;  %3460 = vmatprep.subr.bf16.mxu0 %v3767_v32  ;;  %v3814_v31 = vld [vmem:[#allocation2 + $0x7b0] sm:$0xff]   ;;  %v3815_v32 = vld [vmem:[#allocation2 + $0x768] sm:$0xff]  }
  0xc6   :  { %3482 = vmatprep.subr.bf16.mxu1 %v3768_v33  ;;  %v3816_v33 = vld [vmem:[#allocation2 + $0x7e8] sm:$0xff]  }
  0xc8   :  { %3461 = vmatpush3.bf16.msra.mxu0 %v3769_v34  ;;  %v3817_v34 = vld [vmem:[#allocation2 + $0x728] sm:$0xff]  }
  0xc9   :  { %3483 = vmatpush3.bf16.msra.mxu1 %v3770_v35  ;;  %3462 = vmatprep.subr.bf16.mxu0 %v3771_v36  ;;  %v3818_v35 = vld [vmem:[#allocation2 + $0x7a8] sm:$0xff]   ;;  %v3819_v36 = vld [vmem:[#allocation2 + $0x760] sm:$0xff]  }
  0xca   :  { %3484 = vmatprep.subr.bf16.mxu1 %v3772_v37  ;;  %v3820_v37 = vld [vmem:[#allocation2 + $0x7e0] sm:$0xff]  }
  0xcc   :  { %3463 = vmatpush3.bf16.msra.mxu0 %v3773_v38  ;;  %v3821_v38 = vld [vmem:[#allocation2 + $0x720] sm:$0xff]  }
  0xcd   :  { %3485 = vmatpush3.bf16.msra.mxu1 %v3774_v39  ;;  %3492 = vmatprep.subr.bf16.mxu0 %v3775_v48  ;;  %v3822_v39 = vld [vmem:[#allocation2 + $0x7a0] sm:$0xff]   ;;  %v3831_v48 = vld [vmem:[#allocation2 + $0x748] sm:$0xff]  }
  0xce   :  { %3514 = vmatprep.subr.bf16.mxu1 %v3776_v49  ;;  %v3832_v49 = vld [vmem:[#allocation2 + $0x7c8] sm:$0xff]  }
  0xcf   :  { %2719 = vmatmul.mubr.bf16.vlgmr.msra.gmra.mxu0 %v2960_v44  ;;  %v3827_v44 = vld [vmem:[#allocation2 + $0x750] sm:$0xff]  }
  0xd0   :  { %2760 = vmatmul.mubr.bf16.vlgmr.msra.gmra.mxu1 %v2962_v46  ;;  %3493 = vmatpush3.bf16.msra.mxu0 %v3777_v50  ;;  %v3829_v46 = vld [vmem:[#allocation2 + $0x710] sm:$0xff]   ;;  %v3833_v50 = vld [vmem:[#allocation2 + $0x708] sm:$0xff]  }
  0xd1   :  { %3515 = vmatpush3.bf16.msra.mxu1 %v3778_v51  ;;  %3494 = vmatprep.subr.bf16.mxu0 %v3779_v52  ;;  %v3834_v51 = vld [vmem:[#allocation2 + $0x788] sm:$0xff]   ;;  %v3835_v52 = vld [vmem:[#allocation2 + $0x740] sm:$0xff]  }
  0xd2   :  { %3516 = vmatprep.subr.bf16.mxu1 %v3780_v53  ;;  %2800 = vmatprep.mubr.bf16.mxu0 %v2965_v20  ;;  %v3836_v53 = vld [vmem:[#allocation2 + $0x7c0] sm:$0xff]  }
  0xd3   :  { %2841 = vmatprep.mubr.bf16.mxu1 %v2967_v23 }
  0xd4   :  { %3495 = vmatpush3.bf16.msra.mxu0 %v3781_v54  ;;  %v3837_v54 = vld [vmem:[#allocation2 + $0x700] sm:$0xff]  }
  0xd5   :  { %3517 = vmatpush3.bf16.msra.mxu1 %v3782_v55  ;;  %3496 = vmatprep.subr.bf16.mxu0 %v3783_v56  ;;  %v3838_v55 = vld [vmem:[#allocation2 + $0x780] sm:$0xff]   ;;  %v43_v56 = vld [vmem:[%s3992_s0 + $0x70] sm:$0xff] }
  0xd6   :  { %3518 = vmatprep.subr.bf16.mxu1 %v3784_v57  ;;  %v59_v57 = vld [vmem:[%s3992_s0 + $0xf0] sm:$0xff] }
  0xd8   :  { %3497 = vmatpush3.bf16.msra.mxu0 %v3785_v58  ;;  %v44_v58 = vld [vmem:[%s3992_s0 + $0x78] sm:$0xff] }
  0xd9   :  { %3519 = vmatpush3.bf16.msra.mxu1 %v3786_v59  ;;  %3498 = vmatprep.subr.bf16.mxu0 %v3787_v60  ;;  %v60_v59 = vld [vmem:[%s3992_s0 + $0xf8] sm:$0xff]  ;;  %v2968_v60 = vcombine.low %v43_v56, %v59_v57 }
  0xda   :  { %3520 = vmatprep.subr.bf16.mxu1 %v3788_v61  ;;  %v2969_v61 = vcombine.high %v43_v56, %v59_v57 }
  0xdc   :  { %3499 = vmatpush3.bf16.msra.mxu0 %v3789_v62  ;;  %v2970_v62 = vcombine.low %v44_v58, %v60_v59 }
  0xdd   :  { %3521 = vmatpush3.bf16.msra.mxu1 %v3790_v63  ;;  %3500 = vmatprep.subr.bf16.mxu0 %v3791_v0  ;;  %v2971_v63 = vcombine.high %v44_v58, %v60_v59 }
  0xde   :  { %3522 = vmatprep.subr.bf16.mxu1 %v3792_v1 }
  0xe0   :  { %3501 = vmatpush3.bf16.msra.mxu0 %v3793_v2 }
  0xe1   :  { %3523 = vmatpush3.bf16.msra.mxu1 %v3794_v3  ;;  %3502 = vmatprep.subr.bf16.mxu0 %v3795_v4 }
  0xe2   :  { %3524 = vmatprep.subr.bf16.mxu1 %v3796_v5 }
  0xe4   :  { %3503 = vmatpush3.bf16.msra.mxu0 %v3797_v6 }
  0xe5   :  { %3525 = vmatpush3.bf16.msra.mxu1 %v3798_v7  ;;  %3504 = vmatprep.subr.bf16.mxu0 %v3799_v8 }
  0xe6   :  { %3526 = vmatprep.subr.bf16.mxu1 %v3800_v9 }
  0xe8   :  { %3505 = vmatpush3.bf16.msra.mxu0 %v3801_v10 }
  0xe9   :  { %3527 = vmatpush3.bf16.msra.mxu1 %v3802_v11  ;;  %3506 = vmatprep.subr.bf16.mxu0 %v3803_v12 }
  0xea   :  { %3528 = vmatprep.subr.bf16.mxu1 %v3804_v13 }
  0xec   :  { %3507 = vmatpush3.bf16.msra.mxu0 %v3805_v14 }
  0xed   :  { %3529 = vmatpush3.bf16.msra.mxu1 %v3806_v15  ;;  %3536 = vmatprep.subr.bf16.mxu0 %v3807_v24 }
  0xee   :  { %3558 = vmatprep.subr.bf16.mxu1 %v3808_v25 }
  0xef   :  { %2801 = vmatmul.mubr.bf16.vlgmr.msra.gmra.mxu0 %v2964_v19  ;;  %v3244_v0 = vpop.f32.mrf.mxu0 }
  0xf0   :  { %2842 = vmatmul.mubr.bf16.vlgmr.msra.gmra.mxu1 %v2966_v22  ;;  %3537 = vmatpush3.bf16.msra.mxu0 %v3809_v26  ;;  %v3266_v1 = vpop.f32.mrf.mxu1 }
  0xf1   :  { %3559 = vmatpush3.bf16.msra.mxu1 %v3810_v27  ;;  %3538 = vmatprep.subr.bf16.mxu0 %v3811_v28  ;;  %v3245_v2 = vpop.f32.mrf.mxu0 }
  0xf2   :  { %3560 = vmatprep.subr.bf16.mxu1 %v3812_v29  ;;  %2882 = vmatprep.mubr.bf16.mxu0 %v2969_v61  ;;  %v3267_v3 = vpop.f32.mrf.mxu1 }
  0xf3   :  { %2923 = vmatprep.mubr.bf16.mxu1 %v2971_v63  ;;  %v3247_v4 = vpop.f32.mrf.mxu0 }
  0xf4   :  { %3539 = vmatpush3.bf16.msra.mxu0 %v3813_v30  ;;  %v3269_v5 = vpop.f32.mrf.mxu1 }
  0xf5   :  { %3561 = vmatpush3.bf16.msra.mxu1 %v3814_v31  ;;  %3540 = vmatprep.subr.bf16.mxu0 %v3815_v32  ;;  %v3248_v6 = vpop.f32.mrf.mxu0 }
  0xf6   :  { %3562 = vmatprep.subr.bf16.mxu1 %v3816_v33  ;;  %v3270_v7 = vpop.f32.mrf.mxu1 }
  0xf8   :  { %3541 = vmatpush3.bf16.msra.mxu0 %v3817_v34  ;;  %v3246_v34 = vadd.f32 %v3245_v2, %v3244_v0 }
  0xf9   :  { %3563 = vmatpush3.bf16.msra.mxu1 %v3818_v35  ;;  %3542 = vmatprep.subr.bf16.mxu0 %v3819_v36  ;;  %v2939_v35 = vld [vmem:[%s3994_s2] ss:$0 sm:$0xff] }
  0xfa   :  { %3564 = vmatprep.subr.bf16.mxu1 %v3820_v37 }
  0xfc   :  { %3543 = vmatpush3.bf16.msra.mxu0 %v3821_v38  ;;  %v2311_v38 = vadd.f32 %v3246_v34, %v2939_v35 }
  0xfd   :  { %3565 = vmatpush3.bf16.msra.mxu1 %v3822_v39  ;;  %3544 = vmatprep.subr.bf16.mxu0 %v3823_v40  ;;  %v3268_v39 = vadd.f32 %v3267_v3, %v3266_v1  ;;  %v3249_v40 = vadd.f32 %v3248_v6, %v3247_v4 }
  0xfe   :  { %3566 = vmatprep.subr.bf16.mxu1 %v3824_v41 }
 0x100   :  { %3545 = vmatpush3.bf16.msra.mxu0 %v3825_v42 }
 0x101   :  { %3567 = vmatpush3.bf16.msra.mxu1 %v3826_v43  ;;  %3546 = vmatprep.subr.bf16.mxu0 %v3827_v44  ;;  %v2352_v44 = vadd.f32 %v3268_v39, %v2311_v38 }
 0x102   :  { %3568 = vmatprep.subr.bf16.mxu1 %v3828_v45  ;;  %v2314_v45 = vadd.f32 %v3249_v40, %v2939_v35 }
 0x104   :  { %3547 = vmatpush3.bf16.msra.mxu0 %v3829_v46 }
 0x105   :  { %3569 = vmatpush3.bf16.msra.mxu1 %v3830_v47  ;;  %3548 = vmatprep.subr.bf16.mxu0 %v3831_v48  ;;  %v3271_v47 = vadd.f32 %v3270_v7, %v3269_v5 }
 0x106   :  { %3570 = vmatprep.subr.bf16.mxu1 %v3832_v49 }
 0x108   :  { %3549 = vmatpush3.bf16.msra.mxu0 %v3833_v50 }
 0x109   :  { %3571 = vmatpush3.bf16.msra.mxu1 %v3834_v51  ;;  %3550 = vmatprep.subr.bf16.mxu0 %v3835_v52 }
 0x10a   :  { %3572 = vmatprep.subr.bf16.mxu1 %v3836_v53  ;;  %v2355_v53 = vadd.f32 %v3271_v47, %v2314_v45 }
 0x10c   :  { %3551 = vmatpush3.bf16.msra.mxu0 %v3837_v54 }
 0x10d   :  { %3573 = vmatpush3.bf16.msra.mxu1 %v3838_v55 }
 0x10f   :  { %2883 = vmatmul.mubr.bf16.vlgmr.msra.gmra.mxu0 %v2968_v60  ;;  %v3288_v8 = vpop.f32.mrf.mxu0 }
 0x110   :  { %2924 = vmatmul.mubr.bf16.vlgmr.msra.gmra.mxu1 %v2970_v62  ;;  %v3310_v9 = vpop.f32.mrf.mxu1 }
 0x111   :  { %v3289_v10 = vpop.f32.mrf.mxu0 }
 0x112   :  { %v3311_v11 = vpop.f32.mrf.mxu1  ;;  %v3290_v42 = vadd.f32 %v3289_v10, %v3288_v8 }
 0x113   :  { %v3291_v12 = vpop.f32.mrf.mxu0  ;;  %v3312_v49 = vadd.f32 %v3311_v11, %v3310_v9 }
 0x114   :  { %v3313_v13 = vpop.f32.mrf.mxu1  ;;  %v2393_v48 = vadd.f32 %v3290_v42, %v2352_v44 }
 0x115   :  { %v3292_v14 = vpop.f32.mrf.mxu0 }
 0x116   :  { %v3314_v15 = vpop.f32.mrf.mxu1  ;;  %v3293_v50 = vadd.f32 %v3292_v14, %v3291_v12  ;;  %v2434_v56 = vadd.f32 %v3312_v49, %v2393_v48 }
 0x117   :  { %v3315_v59 = vadd.f32 %v3314_v15, %v3313_v13 }
 0x118   :  { %v2396_v57 = vadd.f32 %v3293_v50, %v2355_v53 }
 0x11a   :  { %v2437_v0 = vadd.f32 %v3315_v59, %v2396_v57 }
 0x12f   :  { %v3332_v16 = vpop.f32.mrf.mxu0 }
 0x130   :  { %v3354_v17 = vpop.f32.mrf.mxu1 }
 0x131   :  { %v3333_v18 = vpop.f32.mrf.mxu0 }
 0x132   :  { %v3355_v19 = vpop.f32.mrf.mxu1  ;;  %v3334_v54 = vadd.f32 %v3333_v18, %v3332_v16 }
 0x133   :  { %v3335_v20 = vpop.f32.mrf.mxu0  ;;  %v3356_v61 = vadd.f32 %v3355_v19, %v3354_v17 }
 0x134   :  { %v3357_v21 = vpop.f32.mrf.mxu1  ;;  %v2475_v60 = vadd.f32 %v3334_v54, %v2434_v56 }
 0x135   :  { %v3336_v22 = vpop.f32.mrf.mxu0 }
 0x136   :  { %v3358_v23 = vpop.f32.mrf.mxu1  ;;  %v3337_v62 = vadd.f32 %v3336_v22, %v3335_v20  ;;  %v2516_v3 = vadd.f32 %v3356_v61, %v2475_v60 }
 0x137   :  { %v3359_v6 = vadd.f32 %v3358_v23, %v3357_v21 }
 0x138   :  { %v2478_v4 = vadd.f32 %v3337_v62, %v2437_v0 }
 0x13a   :  { %v2519_v11 = vadd.f32 %v3359_v6, %v2478_v4 }
 0x14f   :  { %v3376_v24 = vpop.f32.mrf.mxu0 }
 0x150   :  { %v3398_v25 = vpop.f32.mrf.mxu1 }
 0x151   :  { %v3377_v26 = vpop.f32.mrf.mxu0 }
 0x152   :  { %v3399_v27 = vpop.f32.mrf.mxu1  ;;  %v3378_v1 = vadd.f32 %v3377_v26, %v3376_v24 }
 0x153   :  { %v3379_v28 = vpop.f32.mrf.mxu0  ;;  %v3400_v8 = vadd.f32 %v3399_v27, %v3398_v25 }
 0x154   :  { %v3401_v29 = vpop.f32.mrf.mxu1  ;;  %v2557_v7 = vadd.f32 %v3378_v1, %v2516_v3 }
 0x155   :  { %v3380_v30 = vpop.f32.mrf.mxu0 }
 0x156   :  { %v3402_v31 = vpop.f32.mrf.mxu1  ;;  %v3381_v9 = vadd.f32 %v3380_v30, %v3379_v28  ;;  %v2598_v13 = vadd.f32 %v3400_v8, %v2557_v7 }
 0x157   :  { %v3403_v18 = vadd.f32 %v3402_v31, %v3401_v29 }
 0x158   :  { %v2560_v15 = vadd.f32 %v3381_v9, %v2519_v11 }
 0x15a   :  { %v2601_v26 = vadd.f32 %v3403_v18, %v2560_v15 }
 0x16f   :  { %v3420_v32 = vpop.f32.mrf.mxu0 }
 0x170   :  { %v3442_v33 = vpop.f32.mrf.mxu1 }
 0x171   :  { %v3421_v36 = vpop.f32.mrf.mxu0 }
 0x172   :  { %v3443_v37 = vpop.f32.mrf.mxu1  ;;  %v3422_v12 = vadd.f32 %v3421_v36, %v3420_v32 }
 0x173   :  { %v3423_v41 = vpop.f32.mrf.mxu0  ;;  %v3444_v20 = vadd.f32 %v3443_v37, %v3442_v33 }
 0x174   :  { %v3445_v43 = vpop.f32.mrf.mxu1  ;;  %v2639_v19 = vadd.f32 %v3422_v12, %v2598_v13 }
 0x175   :  { %v3424_v46 = vpop.f32.mrf.mxu0 }
 0x176   :  { %v3446_v51 = vpop.f32.mrf.mxu1  ;;  %v3425_v22 = vadd.f32 %v3424_v46, %v3423_v41  ;;  %v2680_v21 = vadd.f32 %v3444_v20, %v2639_v19 }
 0x177   :  { %v3447_v27 = vadd.f32 %v3446_v51, %v3445_v43 }
 0x178   :  { %v2642_v23 = vadd.f32 %v3425_v22, %v2601_v26 }
 0x17a   :  { %v2683_v38 = vadd.f32 %v3447_v27, %v2642_v23 }
 0x18f   :  { %v3464_v52 = vpop.f32.mrf.mxu0 }
 0x190   :  { %v3486_v55 = vpop.f32.mrf.mxu1 }
 0x191   :  { %v3465_v58 = vpop.f32.mrf.mxu0 }
 0x192   :  { %v3487_v63 = vpop.f32.mrf.mxu1  ;;  %v3466_v34 = vadd.f32 %v3465_v58, %v3464_v52 }
 0x193   :  { %v3467_v2 = vpop.f32.mrf.mxu0  ;;  %v3488_v30 = vadd.f32 %v3487_v63, %v3486_v55 }
 0x194   :  { %v3489_v5 = vpop.f32.mrf.mxu1  ;;  %v2721_v28 = vadd.f32 %v3466_v34, %v2680_v21 }
 0x195   :  { %v3468_v10 = vpop.f32.mrf.mxu0 }
 0x196   :  { %v3490_v14 = vpop.f32.mrf.mxu1  ;;  %v3469_v32 = vadd.f32 %v3468_v10, %v3467_v2  ;;  %v2762_v42 = vadd.f32 %v3488_v30, %v2721_v28 }
 0x197   :  { %v3491_v33 = vadd.f32 %v3490_v14, %v3489_v5 }
 0x198   :  { %v2724_v29 = vadd.f32 %v3469_v32, %v2683_v38 }
 0x19a   :  { %v2765_v47 = vadd.f32 %v3491_v33, %v2724_v29 }
 0x1af   :  { %v3508_v16 = vpop.f32.mrf.mxu0 }
 0x1b0   :  { %v3530_v17 = vpop.f32.mrf.mxu1 }
 0x1b1   :  { %v3509_v24 = vpop.f32.mrf.mxu0 }
 0x1b2   :  { %v3531_v35 = vpop.f32.mrf.mxu1  ;;  %v3510_v39 = vadd.f32 %v3509_v24, %v3508_v16 }
 0x1b3   :  { %v3511_v25 = vpop.f32.mrf.mxu0  ;;  %v3532_v41 = vadd.f32 %v3531_v35, %v3530_v17 }
 0x1b4   :  { %v3533_v36 = vpop.f32.mrf.mxu1  ;;  %v2803_v37 = vadd.f32 %v3510_v39, %v2762_v42 }
 0x1b5   :  { %v3512_v40 = vpop.f32.mrf.mxu0 }
 0x1b6   :  { %v3534_v31 = vpop.f32.mrf.mxu1  ;;  %v3513_v44 = vadd.f32 %v3512_v40, %v3511_v25  ;;  %v2844_v43 = vadd.f32 %v3532_v41, %v2803_v37 }
 0x1b7   :  { %v3535_v54 = vadd.f32 %v3534_v31, %v3533_v36 }
 0x1b8   :  { %v2806_v50 = vadd.f32 %v3513_v44, %v2765_v47 }
 0x1ba   :  { %v2847_v59 = vadd.f32 %v3535_v54, %v2806_v50 }
 0x1cf   :  { %v3552_v45 = vpop.f32.mrf.mxu0 }
 0x1d0   :  { %v3574_v46 = vpop.f32.mrf.mxu1 }
 0x1d1   :  { %v3553_v48 = vpop.f32.mrf.mxu0 }
 0x1d2   :  { %v3575_v49 = vpop.f32.mrf.mxu1  ;;  %v3554_v51 = vadd.f32 %v3553_v48, %v3552_v45 }
 0x1d3   :  { %v3555_v52 = vpop.f32.mrf.mxu0  ;;  %v3576_v56 = vadd.f32 %v3575_v49, %v3574_v46 }
 0x1d4   :  { %v3577_v53 = vpop.f32.mrf.mxu1  ;;  %v2885_v55 = vadd.f32 %v3554_v51, %v2844_v43 }
 0x1d5   :  { %v3556_v57 = vpop.f32.mrf.mxu0 }
 0x1d6   :  { %v3578_v58 = vpop.f32.mrf.mxu1  ;;  %v2926_v60 = vadd.f32 %v3576_v56, %v2885_v55  ;;  %v3557_v61 = vadd.f32 %v3556_v57, %v3555_v52 }
 0x1d7   :  { %v3579_v63 = vadd.f32 %v3578_v58, %v3577_v53 }
 0x1d8   :  { %2932 = vst [vmem:[%s3995_s3] sm:$0xff] %v2926_v60  ;;  %v2888_v62 = vadd.f32 %v3557_v61, %v2847_v59 }
 0x1da   :  { %v2929_v0 = vadd.f32 %v3579_v63, %v2888_v62 }
 0x1dc   :  { %2933 = vst [vmem:[%s3995_s3 + $0x8] sm:$0xff] %v2929_v0 }
 0x1dd   :  { %2938 = vsyncpa [#allocation3], 1 }

</bundles_post_ra>
